<compile_context>
chip_gen: v7x
topology: tpu7x:2x2x1
jax: 0.10.0
libtpu: 0.0.40
codegen_flags: <defaults>
</compile_context>

<pallas_src>
import math
from functools import partial

import jax
import jax.numpy as jnp
from jax.experimental import pallas as pl
from jax.experimental.pallas import tpu as pltpu

OUT_C = 5
OUT_D = 3
HEAD_OUT = OUT_C + OUT_D            # 8 — fused, lane-dense head output
H1_LOGICAL, H1_PAD = 400, 512       # 4 * 128
H2_LOGICAL, H2_PAD = 300, 384       # 3 * 128 (3 exact N-passes on v5e's 128-wide MXU)


def _round_up(x, m):
    return ((x + m - 1) // m) * m


def _xavier_uniform(key, fan_in, fan_out, gain=1.0):
    bound = gain * math.sqrt(6.0 / (fan_in + fan_out))
    # PyTorch stores Linear.weight as (out, in); we generate (in, out) directly
    # (same distribution, deterministic given the key).
    return jax.random.uniform(key, (fan_in, fan_out), jnp.float32, -bound, bound)


def init_actor_params(key, s_dim, out_c, out_d, wt_dim):
    """Logical (un-padded) parameters, matching the PyTorch Actor module."""
    k1, k2, k3, k4 = jax.random.split(key, 4)
    in_dim = s_dim + wt_dim
    return {
        "w1": _xavier_uniform(k1, in_dim, H1_LOGICAL),
        "b1": jnp.zeros((1, H1_LOGICAL), jnp.float32),
        "w2": _xavier_uniform(k2, H1_LOGICAL, H2_LOGICAL),
        "b2": jnp.zeros((1, H2_LOGICAL), jnp.float32),
        "wc": _xavier_uniform(k3, H2_LOGICAL, out_c),
        "bc": jnp.zeros((1, out_c), jnp.float32),
        "wd": _xavier_uniform(k4, H2_LOGICAL, out_d),
        "bd": jnp.zeros((1, out_d), jnp.float32),
    }


def pack_actor_params(params, dtype=jnp.bfloat16):
    """One-time packing: zero-pad hidden dims, keep W1 fused, fuse the two heads.

    dtype=bf16 (default) is the production setting: bf16 is the native MXU
    input type on v5e (4x128^2) and v6e/v7x (2x256^2), giving ~2-3x MXU
    throughput over f32 multi-pass emulation and halving the one-time weight
    DMA. f32 accumulation is preserved in-kernel (preferred_element_type=f32)
    and biases stay f32 so bias-add/activations can run in f32 on v5e.
    """
    in_dim = params["w1"].shape[0]
    w1p = jnp.zeros((in_dim, H1_PAD), jnp.float32).at[:, :H1_LOGICAL].set(params["w1"])
    b1p = jnp.zeros((1, H1_PAD), jnp.float32).at[:, :H1_LOGICAL].set(params["b1"])
    w2p = (jnp.zeros((H1_PAD, H2_PAD), jnp.float32)
           .at[:H1_LOGICAL, :H2_LOGICAL].set(params["w2"]))
    b2p = jnp.zeros((1, H2_PAD), jnp.float32).at[:, :H2_LOGICAL].set(params["b2"])
    whp = (jnp.zeros((H2_PAD, HEAD_OUT), jnp.float32)
           .at[:H2_LOGICAL, :OUT_C].set(params["wc"])
           .at[:H2_LOGICAL, OUT_C:].set(params["wd"]))
    bhp = jnp.concatenate([params["bc"], params["bd"]], axis=1)   # (1, 8)
    return {
        "w1": w1p.astype(dtype),    # fused [state | w] -> layer-1 weight
        "b1": b1p,                  # biases stay f32 (v5e-safe elementwise)
        "w2": w2p.astype(dtype),    # TODO(synk): optional fp8 W2 on v7x (needs per-tensor scaling) not implemented
        "b2": b2p,
        "wh": whp.astype(dtype),    # fused cont+disc heads
        "bh": bhp,
    }


def _elementwise_dtype(compute_dtype):
    """bf16 elementwise on chips with a bf16-capable VPU (v6e/v7x); f32 on v5e/older."""
    if jnp.dtype(compute_dtype) != jnp.dtype(jnp.bfloat16):
        return jnp.float32
    try:
        kind = jax.devices()[0].device_kind.lower()
    except Exception:
        return jnp.float32
    if any(tag in kind for tag in ("v6", "v7", "7x")):
        return jnp.bfloat16
    return jnp.float32              # v5e & older: VPU/EUP have no bf16 path


def _actor_kernel(x_ref, w1_ref, b1_ref, w2_ref, b2_ref, wh_ref, bh_ref,
                  out_ref, *, ew_dtype):
    cdt = w1_ref.dtype              # MXU operand dtype (bf16 default / f32)

    # layer 1 — single fused dot over the concatenated [state | w] input
    h1 = jnp.dot(x_ref[...].astype(cdt), w1_ref[...],
                 preferred_element_type=jnp.float32) + b1_ref[...]
    h1 = h1.astype(ew_dtype)
    h1 = jnp.maximum(h1, 0.01 * h1)                          # leaky_relu(0.01)

    h2 = jnp.dot(h1.astype(cdt), w2_ref[...],
                 preferred_element_type=jnp.float32) + b2_ref[...]
    h2 = h2.astype(ew_dtype)
    h2 = jnp.maximum(h2, 0.01 * h2)

    # fused heads: one lane-dense (TB, 8) result
    heads = jnp.dot(h2.astype(cdt), wh_ref[...],
                    preferred_element_type=jnp.float32) + bh_ref[...]

    # sigmoid on lanes [0, OUT_C); pass-through logits on lanes [OUT_C, 8).
    # NOTE: exp(-heads) is also evaluated on the discarded disc lanes; for
    # finite inputs a large value there is masked away by jnp.where (benign).
    sig = pl.reciprocal(1.0 + jnp.exp(-heads), approx=False)
    lane = jax.lax.broadcasted_iota(jnp.int32, heads.shape, dimension=1)
    out_ref[...] = jnp.where(lane < OUT_C, sig, heads)


def actor_forward(packed, state, w, *, block_b=2048):
    """Actor.forward hot path: 3 fused matmuls + activations in one Pallas call.

    Returns (action_c (B, 5) after sigmoid, disc_head logits (B, 3))."""
    state = jnp.asarray(state, jnp.float32)
    w = jnp.asarray(w, jnp.float32)

    # TODO(synk): PyTorch drops rows containing NaN (dynamic output shape);
    # dynamic row filtering is not expressible with static Pallas shapes, so
    # inputs here are assumed NaN-free and the filter is a no-op.
    B, s_dim = state.shape
    wt_dim = w.shape[1]
    in_dim = s_dim + wt_dim

    # torch.cat((state, w), dim=1) done once in the wrapper -> layer 1 is ONE dot.
    x = jnp.concatenate([state, w], axis=1)

    compute_dtype = packed["w1"].dtype
    ew_dtype = _elementwise_dtype(compute_dtype)

    # Batch tiling: rows in multiples of 8, large tiles to amortize the
    # ~0.35us/grid-step overhead.  Always give the "parallel" batch axis >= 2
    # grid steps so both v7x TensorCores get work (a single padded extra tile
    # on the 1-TC v5e/v6e for tiny batches is negligible).
    B8 = _round_up(B, 8)
    TB = min(block_b, B8)
    if B8 <= TB:                               # would otherwise be a 1-step grid
        TB = max(8, _round_up((B8 + 1) // 2, 8))
    Bp = max(_round_up(B8, TB), 2 * TB)
    if Bp != B:
        x = jnp.pad(x, ((0, Bp - B), (0, 0)))
    grid = (Bp // TB,)

    wbytes = jnp.dtype(compute_dtype).itemsize
    weight_bytes = ((in_dim * H1_PAD + H1_PAD * H2_PAD + H2_PAD * HEAD_OUT) * wbytes
                    + (H1_PAD + H2_PAD + HEAD_OUT) * 4)
    cost = pl.CostEstimate(
        flops=2 * Bp * (in_dim * H1_PAD + H1_PAD * H2_PAD + H2_PAD * HEAD_OUT),
        transcendentals=Bp * HEAD_OUT,
        bytes_accessed=weight_bytes + Bp * (in_dim + HEAD_OUT) * 4,
    )

    const2d = lambda i: (0, 0)
    # Weights/biases: constant index_map -> DMAed once, VMEM-resident across the
    # batch grid; Buffered(1) drops the dead second pipeline buffer (VMEM hygiene).
    resident = dict(index_map=const2d, pipeline_mode=pl.Buffered(buffer_count=1))

    out = pl.pallas_call(
        partial(_actor_kernel, ew_dtype=ew_dtype),
        out_shape=jax.ShapeDtypeStruct((Bp, HEAD_OUT), jnp.float32),
        grid=grid,
        in_specs=[
            pl.BlockSpec((TB, in_dim), lambda i: (i, 0)),       # pipelined x tiles
            pl.BlockSpec((in_dim, H1_PAD), **resident),
            pl.BlockSpec((1, H1_PAD), **resident),
            pl.BlockSpec((H1_PAD, H2_PAD), **resident),
            pl.BlockSpec((1, H2_PAD), **resident),
            pl.BlockSpec((H2_PAD, HEAD_OUT), **resident),
            pl.BlockSpec((1, HEAD_OUT), **resident),
        ],
        # fused (TB, 8) head output kept narrow on purpose: masked stores are
        # hidden under MXU work, padding to 128 lanes would 16x the writeback.
        out_specs=pl.BlockSpec((TB, HEAD_OUT), lambda i: (i, 0)),
        compiler_params=pltpu.CompilerParams(dimension_semantics=("parallel",)),
        cost_estimate=cost,
    )(x, packed["w1"], packed["b1"], packed["w2"], packed["b2"],
      packed["wh"], packed["bh"])

    out = out[:B]
    return out[:, :OUT_C], out[:, OUT_C:]


def actor_forward_ref(params, state, w):
    """Pure-JAX reference (highest precision matmuls for a stable baseline)."""
    hp = jax.lax.Precision.HIGHEST
    x = jnp.concatenate([state, w], axis=1).astype(jnp.float32)
    pre1 = jnp.dot(x, params["w1"], precision=hp) + params["b1"]
    h1 = jnp.where(pre1 > 0, pre1, 0.01 * pre1)
    pre2 = jnp.dot(h1, params["w2"], precision=hp) + params["b2"]
    h2 = jnp.where(pre2 > 0, pre2, 0.01 * pre2)
    ac = jax.nn.sigmoid(jnp.dot(h2, params["wc"], precision=hp) + params["bc"])
    ad = jnp.dot(h2, params["wd"], precision=hp) + params["bd"]
    return ac, ad


if __name__ == "__main__":
    key = jax.random.PRNGKey(0)
    k_param, k_state, k_w = jax.random.split(key, 3)

    B, s_dim, wt_dim = 8, 28, 4
    params = init_actor_params(k_param, s_dim, OUT_C, OUT_D, wt_dim)

    state = jax.random.normal(k_state, (B, s_dim), dtype=jnp.float32)
    w = jax.random.uniform(k_w, (B, wt_dim), dtype=jnp.float32)

    ac_ref, ad_ref = actor_forward_ref(params, state, w)

    # f32-weight path: structural check (padding, head fusion, grid, sigmoid).
    ac32, ad32 = jax.block_until_ready(
        actor_forward(pack_actor_params(params, dtype=jnp.float32), state, w))
    assert ac32.shape == (B, OUT_C) and ad32.shape == (B, OUT_D)
    assert jnp.allclose(ac32, ac_ref, atol=2e-2, rtol=2e-2)
    assert jnp.allclose(ad32, ad_ref, atol=2e-2, rtol=2e-2)

    # bf16-weight path (default / production setting): relaxed tolerance.
    ac16, ad16 = jax.block_until_ready(
        actor_forward(pack_actor_params(params), state, w))
    assert ac16.shape == (B, OUT_C) and ad16.shape == (B, OUT_D)
    assert jnp.allclose(ac16, ac_ref, atol=6e-2, rtol=6e-2)
    assert jnp.allclose(ad16, ad_ref, atol=6e-2, rtol=6e-2)

    print("KERNEL_OK")
</pallas_src>

<mosaic_0001>
module attributes {stable_mosaic.version = 11 : i64} {
  func.func @_actor_kernel(%arg0: i32, %arg1: memref<8x32xf32, #tpu.memory_space<vmem>>, %arg2: memref<32x512xf32, #tpu.memory_space<vmem>>, %arg3: memref<1x512xf32, #tpu.memory_space<vmem>>, %arg4: memref<512x384xf32, #tpu.memory_space<vmem>>, %arg5: memref<1x384xf32, #tpu.memory_space<vmem>>, %arg6: memref<384x8xf32, #tpu.memory_space<vmem>>, %arg7: memref<1x8xf32, #tpu.memory_space<vmem>>, %arg8: memref<8x8xf32, #tpu.memory_space<vmem>>) attributes {dimension_semantics = [#tpu.dimension_semantics<parallel>], iteration_bounds = array<i64: 2>, scalar_prefetch = 0 : i64, scratch_operands = 0 : i64, tpu.core_type = #tpu.core_type<tc>, window_params = [{transform_indices = @transform_0, window_bounds = array<i64: 8, 32>}, {pipeline_mode = #tpu.pipeline_mode<synchronous>, transform_indices = @transform_1, window_bounds = array<i64: 32, 512>}, {pipeline_mode = #tpu.pipeline_mode<synchronous>, transform_indices = @transform_2, window_bounds = array<i64: 1, 512>}, {pipeline_mode = #tpu.pipeline_mode<synchronous>, transform_indices = @transform_3, window_bounds = array<i64: 512, 384>}, {pipeline_mode = #tpu.pipeline_mode<synchronous>, transform_indices = @transform_4, window_bounds = array<i64: 1, 384>}, {pipeline_mode = #tpu.pipeline_mode<synchronous>, transform_indices = @transform_5, window_bounds = array<i64: 384, 8>}, {pipeline_mode = #tpu.pipeline_mode<synchronous>, transform_indices = @transform_6, window_bounds = array<i64: 1, 8>}, {transform_indices = @transform_7, window_bounds = array<i64: 8, 8>}]} {
    %c0 = arith.constant 0 : index
    %c0_0 = arith.constant 0 : index
    %0 = vector.load %arg1[%c0, %c0_0] : memref<8x32xf32, #tpu.memory_space<vmem>>, vector<8x32xf32>
    %c0_1 = arith.constant 0 : index
    %c0_2 = arith.constant 0 : index
    %1 = vector.load %arg2[%c0_1, %c0_2] : memref<32x512xf32, #tpu.memory_space<vmem>>, vector<32x512xf32>
    %cst = arith.constant dense<0.000000e+00> : vector<8x512xf32>
    %2 = tpu.matmul %0, %1, %cst {dimension_numbers = #tpu.dot_dimension_numbers<[1], [0], [0], [1], [0, 0, 1, 1], [], []>} : vector<8x32xf32>, vector<32x512xf32>, vector<8x512xf32> -> vector<8x512xf32>
    %c0_3 = arith.constant 0 : index
    %c0_4 = arith.constant 0 : index
    %3 = vector.load %arg3[%c0_3, %c0_4] : memref<1x512xf32, #tpu.memory_space<vmem>>, vector<1x512xf32>
    %4 = vector.broadcast %3 : vector<1x512xf32> to vector<8x512xf32>
    %5 = arith.addf %2, %4 : vector<8x512xf32>
    %cst_5 = arith.constant 0.00999999977 : f32
    %6 = vector.broadcast %cst_5 : f32 to vector<8x512xf32>
    %7 = arith.mulf %6, %5 : vector<8x512xf32>
    %8 = arith.maximumf %5, %7 : vector<8x512xf32>
    %c0_6 = arith.constant 0 : index
    %c0_7 = arith.constant 0 : index
    %9 = vector.load %arg4[%c0_6, %c0_7] : memref<512x384xf32, #tpu.memory_space<vmem>>, vector<512x384xf32>
    %cst_8 = arith.constant dense<0.000000e+00> : vector<8x384xf32>
    %10 = tpu.matmul %8, %9, %cst_8 {dimension_numbers = #tpu.dot_dimension_numbers<[1], [0], [0], [1], [0, 0, 1, 1], [], []>} : vector<8x512xf32>, vector<512x384xf32>, vector<8x384xf32> -> vector<8x384xf32>
    %c0_9 = arith.constant 0 : index
    %c0_10 = arith.constant 0 : index
    %11 = vector.load %arg5[%c0_9, %c0_10] : memref<1x384xf32, #tpu.memory_space<vmem>>, vector<1x384xf32>
    %12 = vector.broadcast %11 : vector<1x384xf32> to vector<8x384xf32>
    %13 = arith.addf %10, %12 : vector<8x384xf32>
    %cst_11 = arith.constant 0.00999999977 : f32
    %14 = vector.broadcast %cst_11 : f32 to vector<8x384xf32>
    %15 = arith.mulf %14, %13 : vector<8x384xf32>
    %16 = arith.maximumf %13, %15 : vector<8x384xf32>
    %c0_12 = arith.constant 0 : index
    %c0_13 = arith.constant 0 : index
    %17 = vector.load %arg6[%c0_12, %c0_13] : memref<384x8xf32, #tpu.memory_space<vmem>>, vector<384x8xf32>
    %cst_14 = arith.constant dense<0.000000e+00> : vector<8x8xf32>
    %18 = tpu.matmul %16, %17, %cst_14 {dimension_numbers = #tpu.dot_dimension_numbers<[1], [0], [0], [1], [0, 0, 1, 1], [], []>} : vector<8x384xf32>, vector<384x8xf32>, vector<8x8xf32> -> vector<8x8xf32>
    %c0_15 = arith.constant 0 : index
    %c0_16 = arith.constant 0 : index
    %19 = vector.load %arg7[%c0_15, %c0_16] : memref<1x8xf32, #tpu.memory_space<vmem>>, vector<1x8xf32>
    %20 = vector.broadcast %19 : vector<1x8xf32> to vector<8x8xf32>
    %21 = arith.addf %18, %20 : vector<8x8xf32>
    %cst_17 = arith.constant 0.000000e+00 : f32
    %22 = vector.broadcast %cst_17 : f32 to vector<8x8xf32>
    %23 = arith.subf %22, %21 : vector<8x8xf32>
    %24 = math.exp %23 : vector<8x8xf32>
    %cst_18 = arith.constant 1.000000e+00 : f32
    %25 = vector.broadcast %cst_18 : f32 to vector<8x8xf32>
    %26 = arith.addf %25, %24 : vector<8x8xf32>
    %27 = tpu.reciprocal %26 : vector<8x8xf32> -> vector<8x8xf32>
    %28 = tpu.iota {dimensions = array<i32: 1>} : vector<8x8xi32>
    %c5_i32 = arith.constant 5 : i32
    %29 = vector.broadcast %c5_i32 : i32 to vector<8x8xi32>
    %30 = arith.cmpi slt, %28, %29 : vector<8x8xi32>
    %31 = arith.select %30, %27, %21 : vector<8x8xi1>, vector<8x8xf32>
    %c0_19 = arith.constant 0 : index
    %c0_20 = arith.constant 0 : index
    %32 = vector.load %arg8[%c0_19, %c0_20] : memref<8x8xf32, #tpu.memory_space<vmem>>, vector<8x8xf32>
    tpu.vector_store %arg8[%c0_19, %c0_20], %31 {strides = array<i32>} : memref<8x8xf32, #tpu.memory_space<vmem>>, vector<8x8xf32>,
    return
  }
  func.func @transform_0(%arg0: i32) -> (i32, i32) {
    %c0_i32 = arith.constant 0 : i32
    %c0_i32_0 = arith.constant 0 : i32
    return %arg0, %c0_i32 : i32, i32
  }
  func.func @transform_1(%arg0: i32) -> (i32, i32) {
    %c0_i32 = arith.constant 0 : i32
    %c0_i32_0 = arith.constant 0 : i32
    %c0_i32_1 = arith.constant 0 : i32
    return %c0_i32, %c0_i32_0 : i32, i32
  }
  func.func @transform_2(%arg0: i32) -> (i32, i32) {
    %c0_i32 = arith.constant 0 : i32
    %c0_i32_0 = arith.constant 0 : i32
    %c0_i32_1 = arith.constant 0 : i32
    return %c0_i32, %c0_i32_0 : i32, i32
  }
  func.func @transform_3(%arg0: i32) -> (i32, i32) {
    %c0_i32 = arith.constant 0 : i32
    %c0_i32_0 = arith.constant 0 : i32
    %c0_i32_1 = arith.constant 0 : i32
    return %c0_i32, %c0_i32_0 : i32, i32
  }
  func.func @transform_4(%arg0: i32) -> (i32, i32) {
    %c0_i32 = arith.constant 0 : i32
    %c0_i32_0 = arith.constant 0 : i32
    %c0_i32_1 = arith.constant 0 : i32
    return %c0_i32, %c0_i32_0 : i32, i32
  }
  func.func @transform_5(%arg0: i32) -> (i32, i32) {
    %c0_i32 = arith.constant 0 : i32
    %c0_i32_0 = arith.constant 0 : i32
    %c0_i32_1 = arith.constant 0 : i32
    return %c0_i32, %c0_i32_0 : i32, i32
  }
  func.func @transform_6(%arg0: i32) -> (i32, i32) {
    %c0_i32 = arith.constant 0 : i32
    %c0_i32_0 = arith.constant 0 : i32
    %c0_i32_1 = arith.constant 0 : i32
    return %c0_i32, %c0_i32_0 : i32, i32
  }
  func.func @transform_7(%arg0: i32) -> (i32, i32) {
    %c0_i32 = arith.constant 0 : i32
    %c0_i32_0 = arith.constant 0 : i32
    return %arg0, %c0_i32 : i32, i32
  }
}

</mosaic_0001>

<bundles_post_ra>
// kernel: tpu_custom_call.1
= control target key start
LH: loop header
LB: loop body
LE: loop exit
PB: predicated region body
PF: predicated region fallthrough
CT: control target
= control target key end

     0   :  { %12 = vsyncpa [#allocation3], 0  ;;  %s1803_s24 = smov 0   ;;  %s2109_s0 = inlined_call_operand.vmem [shape: f32[16,32], index: 0, kind: input, shape index: {}]   ;;  %s2110_s1 = inlined_call_operand.vmem [shape: f32[32,512], index: 1, kind: input, shape index: {}]   ;;  %s2111_s2 = inlined_call_operand.vmem [shape: f32[1,512], index: 2, kind: input, shape index: {}]   ;;  %s2112_s3 = inlined_call_operand.hbm [shape: f32[512,384], index: 3, kind: input, shape index: {}]   ;;  %s2113_s4 = inlined_call_operand.vmem [shape: f32[1,384], index: 4, kind: input, shape index: {}]   ;;  %s2114_s5 = inlined_call_operand.vmem [shape: f32[384,8], index: 5, kind: input, shape index: {}]   ;;  %s2115_s6 = inlined_call_operand.vmem [shape: f32[1,8], index: 6, kind: input, shape index: {}]   ;;  %s2116_s7 = inlined_call_operand.vmem [shape: f32[16,8], index: 7, kind: output, shape index: {}]  }
   0x1 LB: > { %s1809_s25 = sadd.s32 4294967295, %s1755_s24   ;;  %p1252_p0 = scmp.ge.s32.totalorder %s1755_s24, 1  ;;  %s1755_s24 = sphi %s1803_s24, %s18_s24  }
   0x2   : > { %p201_p1 = scmp.lt.s32.totalorder %s1755_s24, 3  ;;  %s1757_s26 = smov [#allocation2]  }
   0x3   : > { %s219_s27 = sshll.u32 %s1757_s26, 4  ;;  %p2117_p3 = scmp.eq.s32.totalorder %s1809_s25, 0  ;;  %s220_s27 = int_to_ptr.vmem [resolvable:$true] %s219_s27 }
   0x4   : > { %p1813_p2 = pnand %p1252_p0, %p201_p1  ;;  %s1717_s9 = scalar_lea.hbm %s2112_s3, 24576 }
   0x5   : > { %p1718_p6 = scmp.ne.s32.totalorder %s2112_s3, %s1717_s9  ;;  %p1724_p10 = scmp.lt.u32.totalorder %s1717_s9, %s2112_s3 }
   0x6   : > { %s2119_s28 = scalar_select %p1813_p2, 1, 0 }
   0x7   : > { %p1693_p4 = pneg %p1813_p2 }
   0x9   : > { %p1822_p5 = pnand %p2117_p3, %p1693_p4 }
   0xb   : > { %p1719_p7 = pneg %p1822_p5 }
   0xd   : > { %p1720_p8 = pnand %p1719_p7, %p1718_p6 }
   0xf   : > { %p1721_p9 = pneg %p1720_p8 }
  0x11   : > { %p1726_p11 = pnand %p1724_p10, %p1721_p9 }
  0x13   : > { %1729 = shalt.err (!%p1726_p11)
}
  0x14   : > { %s1730_s14 = scalar_lea.vmem %s220_s27, 24576  ;;  %p1738_p1 = scmp.lt.s32.totalorder %s220_s27, %s220_s27 }
  0x15   : > { %p1731_p12 = scmp.ne.s32.totalorder %s220_s27, %s1730_s14  ;;  %p1739_p4 = scmp.lt.s32.totalorder %s1730_s14, %s1730_s14 }
  0x17   : > { %p1733_p13 = pnand %p1731_p12, %p1719_p7  ;;  %p1740_p3 = por %p1739_p4, %p1738_p1 }
  0x19   : > { %p1734_p0 = pneg %p1733_p13 }
  0x1b   : > { %p1741_p2 = pnand %p1740_p3, %p1734_p0 }
  0x1d   : > { %1744 = shalt.err (!%p1741_p2)
}
  0x1e   : > { %s1758_s15 = smov 384   ;;  %s1759_s16 = smov 24  }
  0x1f   : > { %1696 = dma.hbm_to_vmem [thread:$0]  (!%p1822_p5), %s2112_s3, 24576, %s220_s27, [#allocation3], %s1758_s15, %s1758_s15, %s1759_s16  }
  0x20   : > { %p2121_p6 = scmp.ne.s32.totalorder %s2119_s28, 0 }
  0x21   : > { %p2122_p8 = scmp.eq.s32.totalorder (!%p2121_p6), %s1809_s25, 0 }
  0x22   : > { %251 = sbr.rel (%p2121_p6) target bundleno = 834 (0x342), region = 48 }
  0x29   : > { %1750 = dma.done.wait (%p2122_p8), [#allocation3], 24576   ;;  %p2123_p7 = pmov %p2122_p8 }
  0x2a   : > { %v1760_v0 = vmov 0.0   ;;  %p281_p2 = scmp.lt.s32.totalorder %s1809_s25, 1  ;;  %v291_v1 = vld [vmem:[%s2110_s1 + $0x8] sm:$0xff]  ;;  %v290_v3 = vld [vmem:[%s2110_s1] sm:$0xff]  ;;  %v293_v12 = vld [vmem:[%s2110_s1 + $0x18] sm:$0xff]  ;;  %vm328_vm0 = vcmask 261120  }
  0x2b   : > { %1752 = vsyncadd (%p2123_p7), [#allocation3], 4294942720  ;;  %396 = vmatprep.mubr.f32.mxu0 %v1760_v0  ;;  %467 = vmatprep.mubr.f32.mxu1 %v1760_v0  ;;  %v295_v2 = vld [vmem:[%s2110_s1 + $0x28] sm:$0xff]  ;;  %v294_v5 = vld [vmem:[%s2110_s1 + $0x20] sm:$0xff]  ;;  %vm1762_vm1 = vmmov 0   ;;  %vm1183_vm3 = vcmask 64512  }
  0x2c   : > { %s2125_s25 = smov (!%p281_p2, %s1809_s25), 1  ;;  %v1421_v4 = vpack.c.bf16 %v295_v2, %v291_v1  ;;  %v299_v6 = vld [vmem:[%s2110_s1 + $0x48] sm:$0xff]  ;;  %v1423_v8 = vpack.c.bf16 %v294_v5, %v290_v3  ;;  %v298_v10 = vld [vmem:[%s2110_s1 + $0x40] sm:$0xff]  ;;  %v297_v13 = vld [vmem:[%s2110_s1 + $0x38] sm:$0xff] }
  0x2d   : > { %v303_v7 = vld [vmem:[%s2110_s1 + $0x68] sm:$0xff]  ;;  %v302_v11 = vld [vmem:[%s2110_s1 + $0x60] sm:$0xff]  ;;  %s1257_s14 = sshll.u32 %s2125_s25, 3  ;;  %v292_v14 = vld [vmem:[%s2110_s1 + $0x10] sm:$0xff]  ;;  %v1429_v16 = vpack.c.bf16 %v297_v13, %v293_v12 }
  0x2e   : > { %v1425_v9 = vpack.c.bf16 %v303_v7, %v299_v6  ;;  %1422 = vmatprep.subr.bf16.mxu0 %v1421_v4  ;;  %v1427_v15 = vpack.c.bf16 %v302_v11, %v298_v10  ;;  %v296_v17 = vld [vmem:[%s2110_s1 + $0x30] sm:$0xff]  ;;  %v301_v18 = vld [vmem:[%s2110_s1 + $0x58] sm:$0xff]  ;;  %s284_s8 = scalar_lea.vmem %s2109_s0, %s1257_s14  ;;  %v483_v24 = vld [vmem:[#allocation2 + $0x8] sm:$0xff]  ;;  %s288_s18 = scalar_lea.vmem %s2116_s7, %s1257_s14 }
  0x2f   : > { %1424 = vmatpush1.bf16.msra.mxu0 %v1423_v8  ;;  %v305_v19 = vld [vmem:[%s2110_s1 + $0x78] sm:$0xff]  ;;  %v1431_v20 = vpack.c.bf16 %v296_v17, %v292_v14  ;;  %v300_v22 = vld [vmem:[%s2110_s1 + $0x50] sm:$0xff]  ;;  %1430 = vmatprep.subr.bf16.mxu1 %v1429_v16  ;;  %v486_v25 = vld [vmem:[#allocation2 + $0x20] sm:$0xff] }
  0x30   : > { %1426 = vmatprep.subr.bf16.mxu0 %v1425_v9  ;;  %v1433_v21 = vpack.c.bf16 %v305_v19, %v301_v18  ;;  %v304_v23 = vld [vmem:[%s2110_s1 + $0x70] sm:$0xff]  ;;  %v482_v26 = vld [vmem:[#allocation2] sm:$0xff]  ;;  %v485_v27 = vld [vmem:[#allocation2 + $0x18] sm:$0xff]  ;;  %v1437_v29 = vpack.c.bf16 %v486_v25, %v483_v24 }
  0x31   : > { %1432 = vmatpush1.bf16.msra.mxu1 %v1431_v20  ;;  %v1435_v28 = vpack.c.bf16 %v304_v23, %v300_v22  ;;  %v489_v30 = vld [vmem:[#allocation2 + $0x38] sm:$0xff]  ;;  %v492_v31 = vld [vmem:[#allocation2 + $0x50] sm:$0xff]  ;;  %v289_v32 = vld [vmem:[%s284_s8] sm:$0xff]  ;;  %v1439_v33 = vpack.c.bf16 %v485_v27, %v482_v26 }
  0x32   : > { %1434 = vmatprep.subr.bf16.mxu1 %v1433_v21  ;;  %v1441_v34 = vpack.c.bf16 %v492_v31, %v489_v30  ;;  %v488_v35 = vld [vmem:[#allocation2 + $0x30] sm:$0xff]  ;;  %v491_v36 = vld [vmem:[#allocation2 + $0x48] sm:$0xff]  ;;  %v498_v38 = vld [vmem:[#allocation2 + $0x80] sm:$0xff] }
  0x33   : > { %1428 = vmatpush1.bf16.msra.mxu0 %v1427_v15  ;;  %v495_v37 = vld [vmem:[#allocation2 + $0x68] sm:$0xff]  ;;  %v1443_v39 = vpack.c.bf16 %v491_v36, %v488_v35  ;;  %v494_v41 = vld [vmem:[#allocation2 + $0x60] sm:$0xff]  ;;  %v497_v42 = vld [vmem:[#allocation2 + $0x78] sm:$0xff] }
  0x34   : > { %1438 = vmatprep.subr.bf16.mxu0 %v1437_v29  ;;  %v1445_v40 = vpack.c.bf16 %v498_v38, %v495_v37  ;;  %v501_v43 = vld [vmem:[#allocation2 + $0x98] sm:$0xff]  ;;  %v504_v44 = vld [vmem:[#allocation2 + $0xb0] sm:$0xff]  ;;  %v1447_v45 = vpack.c.bf16 %v497_v42, %v494_v41  ;;  %v503_v47 = vld [vmem:[#allocation2 + $0xa8] sm:$0xff] }
  0x35   : > { %1436 = vmatpush1.bf16.msra.mxu1 %v1435_v28  ;;  %v500_v46 = vld [vmem:[#allocation2 + $0x90] sm:$0xff]  ;;  %v1449_v48 = vpack.c.bf16 %v504_v44, %v501_v43  ;;  %v507_v49 = vld [vmem:[#allocation2 + $0xc8] sm:$0xff]  ;;  %v510_v52 = vld [vmem:[#allocation2 + $0xe0] sm:$0xff] }
  0x36   : > { %1259 = vmatmul.mubr.msk.f32.vlgmr.msra.gmra.mrb[0].mxu0 %vm328_vm0, %v289_v32  ;;  %v532_v50 = vld [vmem:[#allocation2 + $0x190] sm:$0xff]  ;;  %v535_v51 = vld [vmem:[#allocation2 + $0x1a8] sm:$0xff]  ;;  %v538_v57 = vld [vmem:[#allocation2 + $0x1c0] sm:$0xff]  ;;  %v1451_v58 = vpack.c.bf16 %v503_v47, %v500_v46  ;;  %v1453_v62 = vpack.c.bf16 %v510_v52, %v507_v49 }
  0x37   : > { %1440 = vmatpush1.bf16.msra.mxu0 %v1439_v33  ;;  %v1565_v53 = vpack.c.bf16 %v535_v51, %v532_v50  ;;  %v484_v54 = vld [vmem:[#allocation2 + $0x10] sm:$0xff]  ;;  %v487_v55 = vld [vmem:[#allocation2 + $0x28] sm:$0xff]  ;;  %v506_v59 = vld [vmem:[#allocation2 + $0xc0] sm:$0xff] }
  0x38   : > { %1442 = vmatprep.subr.bf16.mxu0 %v1441_v34  ;;  %1260 = vmatmul.mubr.msk.f32.vlgmr.msra.gmra.mrb[0].mxu1 %vm328_vm0, %v289_v32  ;;  %v1567_v56 = vpack.c.bf16 %v487_v55, %v484_v54  ;;  %v509_v60 = vld [vmem:[#allocation2 + $0xd8] sm:$0xff]  ;;  %v490_v2 = vld [vmem:[#allocation2 + $0x40] sm:$0xff]  ;;  %v516_v4 = vld [vmem:[#allocation2 + $0x110] sm:$0xff] }
  0x39   : > { %1566 = vmatprep.subr.bf16.mxu1 %v1565_v53  ;;  %v541_v61 = vld [vmem:[#allocation2 + $0x1d8] sm:$0xff]  ;;  %v544_v6 = vld [vmem:[#allocation2 + $0x1f0] sm:$0xff]  ;;  %v547_v7 = vld [vmem:[#allocation2 + $0x208] sm:$0xff]  ;;  %v1455_v10 = vpack.c.bf16 %v509_v60, %v506_v59 }
  0x3a   : > { %v513_v63 = vld [vmem:[#allocation2 + $0xf8] sm:$0xff]  ;;  %1568 = vmatpush3.bf16.msra.mxu1 %v1567_v56  ;;  %v1569_v1 = vpack.c.bf16 %v541_v61, %v538_v57  ;;  %v1573_v8 = vpack.c.bf16 %v547_v7, %v544_v6  ;;  %v496_v9 = vld [vmem:[#allocation2 + $0x70] sm:$0xff]  ;;  %v515_v12 = vld [vmem:[#allocation2 + $0x108] sm:$0xff] }
  0x3b   : > { %1444 = vmatpush1.bf16.msra.mxu0 %v1443_v39  ;;  %v493_v3 = vld [vmem:[#allocation2 + $0x58] sm:$0xff]  ;;  %v512_v11 = vld [vmem:[#allocation2 + $0xf0] sm:$0xff]  ;;  %v499_v13 = vld [vmem:[#allocation2 + $0x88] sm:$0xff]  ;;  %v1457_v14 = vpack.c.bf16 %v516_v4, %v513_v63 }
  0x3c   : > { %1446 = vmatprep.subr.bf16.mxu0 %v1445_v40  ;;  %v1571_v5 = vpack.c.bf16 %v493_v3, %v490_v2  ;;  %1570 = vmatprep.subr.bf16.mxu1 %v1569_v1  ;;  %v519_v15 = vld [vmem:[#allocation2 + $0x128] sm:$0xff]  ;;  %v1575_v16 = vpack.c.bf16 %v499_v13, %v496_v9  ;;  %v550_v17 = vld [vmem:[#allocation2 + $0x220] sm:$0xff]  ;;  %v553_v18 = vld [vmem:[#allocation2 + $0x238] sm:$0xff]  ;;  %v1459_v24 = vpack.c.bf16 %v515_v12, %v512_v11 }
  0x3d   : > { %v522_v19 = vld [vmem:[#allocation2 + $0x140] sm:$0xff]  ;;  %v1577_v20 = vpack.c.bf16 %v553_v18, %v550_v17  ;;  %v505_v22 = vld [vmem:[#allocation2 + $0xb8] sm:$0xff]  ;;  %v556_v23 = vld [vmem:[#allocation2 + $0x250] sm:$0xff] }
  0x3e   : > { %1572 = vmatpush3.bf16.msra.mxu1 %v1571_v5  ;;  %v502_v21 = vld [vmem:[#allocation2 + $0xa0] sm:$0xff]  ;;  %v559_v25 = vld [vmem:[#allocation2 + $0x268] sm:$0xff]  ;;  %v1461_v26 = vpack.c.bf16 %v522_v19, %v519_v15  ;;  %v521_v28 = vld [vmem:[#allocation2 + $0x138] sm:$0xff] }
  0x3f   : > { %1448 = vmatpush1.bf16.msra.mxu0 %v1447_v45  ;;  %1574 = vmatprep.subr.bf16.mxu1 %v1573_v8  ;;  %v518_v27 = vld [vmem:[#allocation2 + $0x120] sm:$0xff]  ;;  %v525_v29 = vld [vmem:[#allocation2 + $0x158] sm:$0xff]  ;;  %v1579_v30 = vpack.c.bf16 %v505_v22, %v502_v21  ;;  %v528_v31 = vld [vmem:[#allocation2 + $0x170] sm:$0xff]  ;;  %v1581_v32 = vpack.c.bf16 %v559_v25, %v556_v23 }
  0x40   : > { %1450 = vmatprep.subr.bf16.mxu0 %v1449_v48  ;;  %v508_v33 = vld [vmem:[#allocation2 + $0xd0] sm:$0xff]  ;;  %v511_v34 = vld [vmem:[#allocation2 + $0xe8] sm:$0xff]  ;;  %v562_v35 = vld [vmem:[#allocation2 + $0x280] sm:$0xff]  ;;  %v1463_v37 = vpack.c.bf16 %v521_v28, %v518_v27  ;;  %v1465_v38 = vpack.c.bf16 %v528_v31, %v525_v29 }
  0x41   : > { %v565_v36 = vld [vmem:[#allocation2 + $0x298] sm:$0xff]  ;;  %v524_v39 = vld [vmem:[#allocation2 + $0x150] sm:$0xff]  ;;  %v527_v40 = vld [vmem:[#allocation2 + $0x168] sm:$0xff]  ;;  %v1583_v42 = vpack.c.bf16 %v511_v34, %v508_v33 }
  0x42   : > { %1576 = vmatpush3.bf16.msra.mxu1 %v1575_v16  ;;  %v531_v41 = vld [vmem:[#allocation2 + $0x188] sm:$0xff]  ;;  %v534_v43 = vld [vmem:[#allocation2 + $0x1a0] sm:$0xff]  ;;  %v1585_v44 = vpack.c.bf16 %v565_v36, %v562_v35  ;;  %v517_v46 = vld [vmem:[#allocation2 + $0x118] sm:$0xff]  ;;  %v1467_v47 = vpack.c.bf16 %v527_v40, %v524_v39 }
  0x43   : > { %1452 = vmatpush1.bf16.msra.mxu0 %v1451_v58  ;;  %1578 = vmatprep.subr.bf16.mxu1 %v1577_v20  ;;  %v514_v45 = vld [vmem:[#allocation2 + $0x100] sm:$0xff]  ;;  %v1469_v48 = vpack.c.bf16 %v534_v43, %v531_v41  ;;  %v533_v50 = vld [vmem:[#allocation2 + $0x198] sm:$0xff]  ;;  %v540_v53 = vld [vmem:[#allocation2 + $0x1d0] sm:$0xff] }
  0x44   : > { %1454 = vmatprep.subr.bf16.mxu0 %v1453_v62  ;;  %v530_v49 = vld [vmem:[#allocation2 + $0x180] sm:$0xff]  ;;  %v1587_v51 = vpack.c.bf16 %v517_v46, %v514_v45  ;;  %v537_v52 = vld [vmem:[#allocation2 + $0x1b8] sm:$0xff]  ;;  %v536_v56 = vld [vmem:[#allocation2 + $0x1b0] sm:$0xff] }
  0x45   : > { %v1471_v54 = vpack.c.bf16 %v533_v50, %v530_v49  ;;  %v1473_v55 = vpack.c.bf16 %v540_v53, %v537_v52  ;;  %v539_v57 = vld [vmem:[#allocation2 + $0x1c8] sm:$0xff]  ;;  %v546_v59 = vld [vmem:[#allocation2 + $0x200] sm:$0xff]  ;;  %v545_v63 = vld [vmem:[#allocation2 + $0x1f8] sm:$0xff]  ;;  %v308_v50 = vlaneseq }
  0x46   : > { %1580 = vmatpush3.bf16.msra.mxu1 %v1579_v30  ;;  %v543_v58 = vld [vmem:[#allocation2 + $0x1e8] sm:$0xff]  ;;  %v1475_v60 = vpack.c.bf16 %v539_v57, %v536_v56  ;;  %v542_v62 = vld [vmem:[#allocation2 + $0x1e0] sm:$0xff]  ;;  %v549_v1 = vld [vmem:[#allocation2 + $0x218] sm:$0xff] }
  0x47   : > { %1456 = vmatpush1.bf16.msra.mxu0 %v1455_v10  ;;  %1582 = vmatprep.subr.bf16.mxu1 %v1581_v32  ;;  %v1477_v61 = vpack.c.bf16 %v546_v59, %v543_v58  ;;  %v552_v2 = vld [vmem:[#allocation2 + $0x230] sm:$0xff]  ;;  %v1479_v3 = vpack.c.bf16 %v545_v63, %v542_v62  ;;  %v551_v6 = vld [vmem:[#allocation2 + $0x228] sm:$0xff]  ;;  %v558_v8 = vld [vmem:[#allocation2 + $0x260] sm:$0xff] }
  0x48   : > { %1458 = vmatprep.subr.bf16.mxu0 %v1457_v14  ;;  %v1481_v4 = vpack.c.bf16 %v552_v2, %v549_v1  ;;  %v548_v5 = vld [vmem:[#allocation2 + $0x210] sm:$0xff]  ;;  %v555_v7 = vld [vmem:[#allocation2 + $0x248] sm:$0xff]  ;;  %v554_v11 = vld [vmem:[#allocation2 + $0x240] sm:$0xff] }
  0x49   : > { %v1483_v9 = vpack.c.bf16 %v551_v6, %v548_v5  ;;  %v1485_v10 = vpack.c.bf16 %v558_v8, %v555_v7  ;;  %v557_v12 = vld [vmem:[#allocation2 + $0x258] sm:$0xff]  ;;  %v564_v14 = vld [vmem:[#allocation2 + $0x290] sm:$0xff]  ;;  %v563_v18 = vld [vmem:[#allocation2 + $0x288] sm:$0xff] }
  0x4a   : > { %1584 = vmatpush3.bf16.msra.mxu1 %v1583_v42  ;;  %v561_v13 = vld [vmem:[#allocation2 + $0x278] sm:$0xff]  ;;  %v1487_v15 = vpack.c.bf16 %v557_v12, %v554_v11  ;;  %v560_v17 = vld [vmem:[#allocation2 + $0x270] sm:$0xff]  ;;  %v567_v20 = vld [vmem:[#allocation2 + $0x2a8] sm:$0xff] }
  0x4b   : > { %1460 = vmatpush1.bf16.msra.mxu0 %v1459_v24  ;;  %1586 = vmatprep.subr.bf16.mxu1 %v1585_v44  ;;  %v1489_v16 = vpack.c.bf16 %v564_v14, %v561_v13  ;;  %v1491_v19 = vpack.c.bf16 %v563_v18, %v560_v17  ;;  %v570_v21 = vld [vmem:[#allocation2 + $0x2c0] sm:$0xff]  ;;  %v568_v22 = vld [vmem:[#allocation2 + $0x2b0] sm:$0xff]  ;;  %v571_v24 = vld [vmem:[#allocation2 + $0x2c8] sm:$0xff] }
  0x4c   : > { %1462 = vmatprep.subr.bf16.mxu0 %v1461_v26  ;;  %v1493_v23 = vpack.c.bf16 %v570_v21, %v567_v20  ;;  %v566_v25 = vld [vmem:[#allocation2 + $0x2a0] sm:$0xff]  ;;  %v569_v26 = vld [vmem:[#allocation2 + $0x2b8] sm:$0xff]  ;;  %v1589_v27 = vpack.c.bf16 %v571_v24, %v568_v22  ;;  %v520_v29 = vld [vmem:[#allocation2 + $0x130] sm:$0xff] }
  0x4d   : > { %v1495_v28 = vpack.c.bf16 %v569_v26, %v566_v25  ;;  %v523_v30 = vld [vmem:[#allocation2 + $0x148] sm:$0xff]  ;;  %v573_v32 = vld [vmem:[#allocation2 + $0x2d8] sm:$0xff]  ;;  %v576_v33 = vld [vmem:[#allocation2 + $0x2f0] sm:$0xff] }
  0x4e   : > { %1588 = vmatpush3.bf16.msra.mxu1 %v1587_v51  ;;  %v1591_v31 = vpack.c.bf16 %v523_v30, %v520_v29  ;;  %v574_v34 = vld [vmem:[#allocation2 + $0x2e0] sm:$0xff]  ;;  %v1497_v35 = vpack.c.bf16 %v576_v33, %v573_v32  ;;  %v577_v36 = vld [vmem:[#allocation2 + $0x2f8] sm:$0xff]  ;;  %v579_v44 = vld [vmem:[#allocation2 + $0x308] sm:$0xff]  ;;  %v1911_v51 = vshrl.u32 %v308_v50, 7 }
  0x4f   : > { %1464 = vmatpush1.bf16.msra.mxu0 %v1463_v37  ;;  %1590 = vmatprep.subr.bf16.mxu1 %v1589_v27  ;;  %v572_v37 = vld [vmem:[#allocation2 + $0x2d0] sm:$0xff]  ;;  %v1593_v39 = vpack.c.bf16 %v577_v36, %v574_v34  ;;  %v526_v41 = vld [vmem:[#allocation2 + $0x160] sm:$0xff]  ;;  %v529_v42 = vld [vmem:[#allocation2 + $0x178] sm:$0xff] }
  0x50   : > { %1466 = vmatprep.subr.bf16.mxu0 %v1465_v38  ;;  %v575_v38 = vld [vmem:[#allocation2 + $0x2e8] sm:$0xff]  ;;  %v1595_v43 = vpack.c.bf16 %v529_v42, %v526_v41  ;;  %v582_v45 = vld [vmem:[#allocation2 + $0x320] sm:$0xff]  ;;  %v628_v46 = vld [vmem:[#allocation2 + $0x490] sm:$0xff]  ;;  %v310_v52 = vsub.s32 0, %v1911_v51  ;;  %v322_v56 = vsub.s32 3, %v1911_v51 }
  0x51   : > { %v1499_v40 = vpack.c.bf16 %v575_v38, %v572_v37  ;;  %v1917_v53 = vld [vmem:[%s2111_s2] sm:$0xf]  ;;  %v581_v1 = vld [vmem:[#allocation2 + $0x318] sm:$0xff]  ;;  %v588_v8 = vld [vmem:[#allocation2 + $0x350] sm:$0xff] }
  0x52   : > { %1592 = vmatpush3.bf16.msra.mxu1 %v1591_v31  ;;  %v578_v63 = vld [vmem:[#allocation2 + $0x300] sm:$0xff]  ;;  %v585_v5 = vld [vmem:[#allocation2 + $0x338] sm:$0xff]  ;;  %v587_v17 = vld [vmem:[#allocation2 + $0x348] sm:$0xff] }
  0x53   : > { %1468 = vmatpush1.bf16.msra.mxu0 %v1467_v47  ;;  %1594 = vmatprep.subr.bf16.mxu1 %v1593_v39  ;;  %v1501_v47 = vpack.c.bf16 %v582_v45, %v579_v44  ;;  %v1503_v14 = vpack.c.bf16 %v581_v1, %v578_v63  ;;  %v586_v21 = vld [vmem:[#allocation2 + $0x340] sm:$0xff]  ;;  %v589_v22 = vld [vmem:[#allocation2 + $0x358] sm:$0xff]  ;;  %v640_v26 = vld [vmem:[#allocation2 + $0x4f0] sm:$0xff] }
  0x54   : > { %1470 = vmatprep.subr.bf16.mxu0 %v1469_v48  ;;  %v631_v48 = vld [vmem:[#allocation2 + $0x4a8] sm:$0xff]  ;;  %v594_v25 = vld [vmem:[#allocation2 + $0x380] sm:$0xff]  ;;  %v1603_v30 = vpack.c.bf16 %v589_v22, %v586_v21  ;;  %v593_v32 = vld [vmem:[#allocation2 + $0x378] sm:$0xff] }
  0x55   : > { %v1597_v49 = vpack.c.bf16 %v631_v48, %v628_v46  ;;  %v643_v27 = vld [vmem:[#allocation2 + $0x508] sm:$0xff]  ;;  %v590_v31 = vld [vmem:[#allocation2 + $0x360] sm:$0xff]  ;;  %v597_v37 = vld [vmem:[#allocation2 + $0x398] sm:$0xff] }
  0x56   : > { %1596 = vmatpush3.bf16.msra.mxu1 %v1595_v43  ;;  %v1605_v34 = vpack.c.bf16 %v643_v27, %v640_v26  ;;  %v595_v36 = vld [vmem:[#allocation2 + $0x388] sm:$0xff]  ;;  %v600_v38 = vld [vmem:[#allocation2 + $0x3b0] sm:$0xff]  ;;  %v646_v39 = vld [vmem:[#allocation2 + $0x520] sm:$0xff]  ;;  %v1511_v41 = vpack.c.bf16 %v593_v32, %v590_v31 }
  0x57   : > { %1472 = vmatpush1.bf16.msra.mxu0 %v1471_v54  ;;  %1598 = vmatprep.subr.bf16.mxu1 %v1597_v49  ;;  %v314_v54 = vsub.s32 1, %v1911_v51  ;;  %v596_v43 = vld [vmem:[#allocation2 + $0x390] sm:$0xff]  ;;  %v599_v44 = vld [vmem:[#allocation2 + $0x3a8] sm:$0xff]  ;;  %v1513_v45 = vpack.c.bf16 %v600_v38, %v597_v37  ;;  %v601_v48 = vld [vmem:[#allocation2 + $0x3b8] sm:$0xff] }
  0x58   : > { %1474 = vmatprep.subr.bf16.mxu0 %v1473_v55  ;;  %v311_v55 = vrot.slane %v1917_v53, %v310_v52  ;;  %v603_v49 = vld [vmem:[#allocation2 + $0x3c8] sm:$0xff]  ;;  %v604_v1 = vld [vmem:[#allocation2 + $0x3d0] sm:$0xff]  ;;  %v670_v32 = vld [vmem:[#allocation2 + $0x5e0] sm:$0xff] }
  0x59   : > { %v315_v57 = vrot.slane %v1917_v53, %v314_v54  ;;  %v624_v31 = vld [vmem:[#allocation2 + $0x470] sm:$0xff] }
  0x5b   : > { %1476 = vmatpush1.bf16.msra.mxu0 %v1475_v60 }
  0x5c   : > { %1478 = vmatprep.subr.bf16.mxu0 %v1477_v61  ;;  %v323_v61 = vrot.slane %v1917_v53, %v322_v56  ;;  %v652_v56 = vld [vmem:[#allocation2 + $0x550] sm:$0xff] }
  0x5f   : > { %1480 = vmatpush1.bf16.msra.mxu0 %v1479_v3  ;;  %v580_v3 = vld [vmem:[#allocation2 + $0x310] sm:$0xff] }
  0x60   : > { %1482 = vmatprep.subr.bf16.mxu0 %v1481_v4  ;;  %v583_v4 = vld [vmem:[#allocation2 + $0x328] sm:$0xff] }
  0x63   : > { %1484 = vmatpush1.bf16.msra.mxu0 %v1483_v9  ;;  %v634_v9 = vld [vmem:[#allocation2 + $0x4c0] sm:$0xff] }
  0x64   : > { %1486 = vmatprep.subr.bf16.mxu0 %v1485_v10  ;;  %v637_v10 = vld [vmem:[#allocation2 + $0x4d8] sm:$0xff] }
  0x65   : > { %v1601_v20 = vpack.c.bf16 %v637_v10, %v634_v9 }
  0x67   : > { %1488 = vmatpush1.bf16.msra.mxu0 %v1487_v15  ;;  %v1599_v15 = vpack.c.bf16 %v583_v4, %v580_v3  ;;  %v609_v3 = vld [vmem:[#allocation2 + $0x3f8] sm:$0xff]  ;;  %v612_v4 = vld [vmem:[#allocation2 + $0x410] sm:$0xff] }
  0x68   : > { %1490 = vmatprep.subr.bf16.mxu0 %v1489_v16  ;;  %v584_v16 = vld [vmem:[#allocation2 + $0x330] sm:$0xff] }
  0x69   : > { %v1507_v29 = vpack.c.bf16 %v587_v17, %v584_v16  ;;  %v613_v16 = vld [vmem:[#allocation2 + $0x418] sm:$0xff]  ;;  %v615_v17 = vld [vmem:[#allocation2 + $0x428] sm:$0xff] }
  0x6b   : > { %1492 = vmatpush1.bf16.msra.mxu0 %v1491_v19  ;;  %v1505_v19 = vpack.c.bf16 %v588_v8, %v585_v5  ;;  %v658_v5 = vld [vmem:[#allocation2 + $0x580] sm:$0xff]  ;;  %v318_v8 = vsub.s32 2, %v1911_v51  ;;  %v1013_v51 = vld [vmem:[%s2114_s5 + $0x110] sm:$0xff] }
  0x6c   : > { %1494 = vmatprep.subr.bf16.mxu0 %v1493_v23  ;;  %v591_v23 = vld [vmem:[#allocation2 + $0x368] sm:$0xff] }
  0x6d   : > { %v1509_v33 = vpack.c.bf16 %v594_v25, %v591_v23  ;;  %v319_v21 = vrot.slane %v1917_v53, %v318_v8  ;;  %v617_v25 = vld [vmem:[#allocation2 + $0x438] sm:$0xff] }
  0x6f   : > { %1496 = vmatpush1.bf16.msra.mxu0 %v1495_v28 }
  0x70   : > { %1498 = vmatprep.subr.bf16.mxu0 %v1497_v35  ;;  %v592_v35 = vld [vmem:[#allocation2 + $0x370] sm:$0xff] }
  0x71   : > { %v1607_v42 = vpack.c.bf16 %v595_v36, %v592_v35  ;;  %v620_v36 = vld [vmem:[#allocation2 + $0x450] sm:$0xff] }
  0x73   : > { %1500 = vmatpush1.bf16.msra.mxu0 %v1499_v40  ;;  %v649_v40 = vld [vmem:[#allocation2 + $0x538] sm:$0xff] }
  0x74   : > { %1502 = vmatprep.subr.bf16.mxu0 %v1501_v47  ;;  %v1609_v46 = vpack.c.bf16 %v649_v40, %v646_v39  ;;  %v598_v47 = vld [vmem:[#allocation2 + $0x3a0] sm:$0xff]  ;;  %v623_v39 = vld [vmem:[#allocation2 + $0x468] sm:$0xff] }
  0x75   : > { %v622_v40 = vld [vmem:[#allocation2 + $0x460] sm:$0xff] }
 0x109   : > { %v398_v58 = vpop.f32.mrb[0].mxu0 }
 0x10a   : > { %v399_v59 = vadd.f32 %v398_v58, %v311_v55  ;;  %v400_v60 = vpop.f32.mrb[1].mxu0  ;;  %v606_v55 = vld [vmem:[#allocation2 + $0x3e0] sm:$0xff]  ;;  %v1515_v58 = vpack.c.bf16 %v599_v44, %v596_v43 }
 0x10b   : > { %v401_v62 = vadd.f32 %v400_v60, %v315_v57  ;;  %v1928_v6 = vpop.f32.mrb[0].mxu1  ;;  %v655_v57 = vld [vmem:[#allocation2 + $0x568] sm:$0xff]  ;;  %v602_v60 = vld [vmem:[#allocation2 + $0x3c0] sm:$0xff] }
 0x10c   : > { %v474_v2 = vmul.f32 0.01, %v399_v59  ;;  %v471_v11 = vpop.f32.mrb[1].mxu1  ;;  %v1613_v63 = vpack.c.bf16 %v655_v57, %v652_v56  ;;  %v630_v43 = vld [vmem:[#allocation2 + $0x4a0] sm:$0xff] }
 0x10d   : > { %v475_v7 = vmul.f32 0.01, %v401_v62  ;;  %v472_v12 = vadd.f32 %v471_v11, %v323_v61  ;;  %v605_v61 = vld [vmem:[#allocation2 + $0x3d8] sm:$0xff]  ;;  %v608_v11 = vld [vmem:[#allocation2 + $0x3f0] sm:$0xff] }
 0x10e   : > { %v478_v18 = vmax.f32 %v399_v59, %v474_v2  ;;  %v1611_v59 = vpack.c.bf16 %v601_v48, %v598_v47  ;;  %v607_v2 = vld [vmem:[#allocation2 + $0x3e8] sm:$0xff]  ;;  %v1519_v9 = vpack.c.bf16 %v605_v61, %v602_v60  ;;  %v626_v47 = vld [vmem:[#allocation2 + $0x480] sm:$0xff]  ;;  %v629_v48 = vld [vmem:[#allocation2 + $0x498] sm:$0xff] }
 0x10f   : > { %v479_v13 = vmax.f32 %v401_v62, %v475_v7  ;;  %v477_v24 = vmul.f32 0.01, %v472_v12  ;;  %v1517_v62 = vpack.c.bf16 %v606_v55, %v603_v49  ;;  %v661_v7 = vld [vmem:[#allocation2 + $0x598] sm:$0xff]  ;;  %v1615_v10 = vpack.c.bf16 %v607_v2, %v604_v1  ;;  %v636_v55 = vld [vmem:[#allocation2 + $0x4d0] sm:$0xff]  ;;  %v635_v60 = vld [vmem:[#allocation2 + $0x4c8] sm:$0xff] }
 0x110   : > { %v633_v49 = vld [vmem:[#allocation2 + $0x4b8] sm:$0xff]  ;;  %v1535_v57 = vpack.c.bf16 %v629_v48, %v626_v47  ;;  %v639_v61 = vld [vmem:[#allocation2 + $0x4e8] sm:$0xff]  ;;  %v638_v2 = vld [vmem:[#allocation2 + $0x4e0] sm:$0xff] }
 0x111   : > { %755 = vmatprep.mubr.f32.mxu0 %v479_v13  ;;  %897 = vmatprep.mubr.f32.mxu1 %v479_v13  ;;  %v481_v28 = vmax.f32 %v472_v12, %v477_v24  ;;  %v611_v12 = vld [vmem:[#allocation2 + $0x408] sm:$0xff]  ;;  %v1521_v13 = vpack.c.bf16 %v612_v4, %v609_v3  ;;  %v614_v24 = vld [vmem:[#allocation2 + $0x420] sm:$0xff]  ;;  %v641_v3 = vld [vmem:[#allocation2 + $0x4f8] sm:$0xff] }
 0x112   : > { %756 = vmatmul.mubr.f32.vlgmr.msra.gmra.mrb[2].mxu0 %v478_v18  ;;  %898 = vmatmul.mubr.f32.vlgmr.msra.gmra.mrb[2].mxu1 %v478_v18  ;;  %v618_v18 = vld [vmem:[#allocation2 + $0x440] sm:$0xff]  ;;  %v1523_v22 = vpack.c.bf16 %v611_v12, %v608_v11  ;;  %v1527_v53 = vpack.c.bf16 %v617_v25, %v614_v24  ;;  %v645_v4 = vld [vmem:[#allocation2 + $0x518] sm:$0xff]  ;;  %v647_v11 = vld [vmem:[#allocation2 + $0x528] sm:$0xff] }
 0x113   : > { %1504 = vmatpush1.bf16.msra.mxu0 %v1503_v14  ;;  %1600 = vmatpush3.bf16.msra.mxu1 %v1599_v15  ;;  %v1617_v14 = vpack.c.bf16 %v661_v7, %v658_v5  ;;  %v610_v15 = vld [vmem:[#allocation2 + $0x400] sm:$0xff]  ;;  %v1525_v26 = vpack.c.bf16 %v618_v18, %v615_v17  ;;  %v648_v5 = vld [vmem:[#allocation2 + $0x530] sm:$0xff]  ;;  %v1543_v7 = vpack.c.bf16 %v641_v3, %v638_v2  ;;  %v651_v12 = vld [vmem:[#allocation2 + $0x548] sm:$0xff] }
 0x114   : > { %1506 = vmatprep.subr.bf16.mxu0 %v1505_v19  ;;  %1602 = vmatprep.subr.bf16.mxu1 %v1601_v20  ;;  %v664_v19 = vld [vmem:[#allocation2 + $0x5b0] sm:$0xff]  ;;  %v667_v20 = vld [vmem:[#allocation2 + $0x5c8] sm:$0xff]  ;;  %v1619_v23 = vpack.c.bf16 %v613_v16, %v610_v15  ;;  %v650_v16 = vld [vmem:[#allocation2 + $0x540] sm:$0xff] }
 0x115   : > { %967 = vmatprep.mubr.f32.mxu1 %v481_v28  ;;  %826 = vmatprep.mubr.f32.mxu0 %v481_v28  ;;  %v1621_v27 = vpack.c.bf16 %v667_v20, %v664_v19  ;;  %v616_v28 = vld [vmem:[#allocation2 + $0x430] sm:$0xff]  ;;  %v653_v17 = vld [vmem:[#allocation2 + $0x558] sm:$0xff]  ;;  %v663_v24 = vld [vmem:[#allocation2 + $0x5a8] sm:$0xff] }
 0x116   : > { %v657_v18 = vld [vmem:[#allocation2 + $0x578] sm:$0xff]  ;;  %v660_v19 = vld [vmem:[#allocation2 + $0x590] sm:$0xff]  ;;  %v1551_v20 = vpack.c.bf16 %v653_v17, %v650_v16  ;;  %v666_v25 = vld [vmem:[#allocation2 + $0x5c0] sm:$0xff] }
 0x117   : > { %1508 = vmatpush1.bf16.msra.mxu0 %v1507_v29  ;;  %1604 = vmatpush3.bf16.msra.mxu1 %v1603_v30  ;;  %v619_v29 = vld [vmem:[#allocation2 + $0x448] sm:$0xff]  ;;  %v621_v30 = vld [vmem:[#allocation2 + $0x458] sm:$0xff] }
 0x118   : > { %1510 = vmatprep.subr.bf16.mxu0 %v1509_v33  ;;  %1606 = vmatprep.subr.bf16.mxu1 %v1605_v34  ;;  %v673_v33 = vld [vmem:[#allocation2 + $0x5f8] sm:$0xff]  ;;  %v470_v34 = vadd.f32 %v1928_v6, %v319_v21  ;;  %v1623_v35 = vpack.c.bf16 %v619_v29, %v616_v28  ;;  %v1529_v37 = vpack.c.bf16 %v624_v31, %v621_v30  ;;  %v662_v28 = vld [vmem:[#allocation2 + $0x5a0] sm:$0xff]  ;;  %v672_v31 = vld [vmem:[#allocation2 + $0x5f0] sm:$0xff] }
 0x119   : > { %v1625_v38 = vpack.c.bf16 %v673_v33, %v670_v32  ;;  %v1553_v21 = vpack.c.bf16 %v660_v19, %v657_v18  ;;  %v665_v29 = vld [vmem:[#allocation2 + $0x5b8] sm:$0xff]  ;;  %v1000_v47 = vld [vmem:[%s2114_s5 + $0xa8] sm:$0xff]  ;;  %v991_v18 = vld [vmem:[%s2114_s5 + $0x60] sm:$0xff] }
 0x11a   : > { %v476_v44 = vmul.f32 0.01, %v470_v34  ;;  %v669_v30 = vld [vmem:[#allocation2 + $0x5d8] sm:$0xff]  ;;  %v1559_v32 = vpack.c.bf16 %v665_v29, %v662_v28  ;;  %v1008_v16 = vld [vmem:[%s2114_s5 + $0xe8] sm:$0xff] }
 0x11b   : > { %1512 = vmatpush1.bf16.msra.mxu0 %v1511_v41  ;;  %1608 = vmatpush3.bf16.msra.mxu1 %v1607_v42  ;;  %v625_v41 = vld [vmem:[#allocation2 + $0x478] sm:$0xff]  ;;  %v627_v42 = vld [vmem:[#allocation2 + $0x488] sm:$0xff]  ;;  %v1561_v33 = vpack.c.bf16 %v672_v31, %v669_v30  ;;  %v674_v31 = vld [vmem:[%s2113_s4] sm:$0x7] }
 0x11c   : > { %1514 = vmatprep.subr.bf16.mxu0 %v1513_v45  ;;  %1610 = vmatprep.subr.bf16.mxu1 %v1609_v46  ;;  %v1531_v45 = vpack.c.bf16 %v623_v39, %v620_v36  ;;  %v1627_v46 = vpack.c.bf16 %v625_v41, %v622_v40  ;;  %v1533_v6 = vpack.c.bf16 %v630_v43, %v627_v42  ;;  %v995_v36 = vld [vmem:[%s2114_s5 + $0x80] sm:$0xff]  ;;  %v980_v40 = vld [vmem:[%s2114_s5 + $0x8] sm:$0xff]  ;;  %v997_v42 = vld [vmem:[%s2114_s5 + $0x90] sm:$0xff] }
 0x11d   : > { %v480_v56 = vmax.f32 %v470_v34, %v476_v44  ;;  %v668_v34 = vld [vmem:[#allocation2 + $0x5d0] sm:$0xff]  ;;  %v979_v39 = vld [vmem:[%s2114_s5] sm:$0xff]  ;;  %v998_v43 = vld [vmem:[%s2114_s5 + $0x98] sm:$0xff] }
 0x11e   : > { %v1631_v41 = vpack.c.bf16 %v980_v40, %v979_v39  ;;  %v981_v44 = vld [vmem:[%s2114_s5 + $0x10] sm:$0xff]  ;;  %v992_v19 = vld [vmem:[%s2114_s5 + $0x68] sm:$0xff] }
 0x11f   : > { %1516 = vmatpush1.bf16.msra.mxu0 %v1515_v58  ;;  %1612 = vmatpush3.bf16.msra.mxu1 %v1611_v59  ;;  %v1537_v58 = vpack.c.bf16 %v636_v55, %v633_v49  ;;  %v632_v59 = vld [vmem:[#allocation2 + $0x4b0] sm:$0xff]  ;;  %v983_v55 = vld [vmem:[%s2114_s5 + $0x20] sm:$0xff] }
 0x120   : > { %1518 = vmatprep.subr.bf16.mxu0 %v1517_v62  ;;  %1614 = vmatprep.subr.bf16.mxu1 %v1613_v63  ;;  %v642_v62 = vld [vmem:[#allocation2 + $0x500] sm:$0xff]  ;;  %v1539_v63 = vpack.c.bf16 %v635_v60, %v632_v59 }
 0x121   : > { %v1541_v1 = vpack.c.bf16 %v642_v62, %v639_v61  ;;  %v985_v61 = vld [vmem:[%s2114_s5 + $0x30] sm:$0xff]  ;;  %v986_v62 = vld [vmem:[%s2114_s5 + $0x38] sm:$0xff] }
 0x122   : > { %v1643_v2 = vpack.c.bf16 %v986_v62, %v985_v61  ;;  %v1021_v61 = vld [vmem:[%s2114_s5 + $0x150] sm:$0xff]  ;;  %v1022_v62 = vld [vmem:[%s2114_s5 + $0x158] sm:$0xff] }
 0x123   : > { %1520 = vmatpush1.bf16.msra.mxu0 %v1519_v9  ;;  %1616 = vmatpush3.bf16.msra.mxu1 %v1615_v10  ;;  %v1545_v9 = vpack.c.bf16 %v648_v5, %v645_v4  ;;  %v644_v10 = vld [vmem:[#allocation2 + $0x510] sm:$0xff]  ;;  %v987_v4 = vld [vmem:[%s2114_s5 + $0x40] sm:$0xff]  ;;  %v988_v5 = vld [vmem:[%s2114_s5 + $0x48] sm:$0xff] }
 0x124   : > { %1522 = vmatprep.subr.bf16.mxu0 %v1521_v13  ;;  %1618 = vmatprep.subr.bf16.mxu1 %v1617_v14  ;;  %v654_v13 = vld [vmem:[#allocation2 + $0x560] sm:$0xff]  ;;  %v1547_v14 = vpack.c.bf16 %v647_v11, %v644_v10  ;;  %v1647_v10 = vpack.c.bf16 %v988_v5, %v987_v4  ;;  %v1025_v4 = vld [vmem:[%s2114_s5 + $0x170] sm:$0xff]  ;;  %v1026_v5 = vld [vmem:[%s2114_s5 + $0x178] sm:$0xff] }
 0x125   : > { %v1549_v15 = vpack.c.bf16 %v654_v13, %v651_v12  ;;  %v989_v12 = vld [vmem:[%s2114_s5 + $0x50] sm:$0xff]  ;;  %v990_v13 = vld [vmem:[%s2114_s5 + $0x58] sm:$0xff] }
 0x127   : > { %1524 = vmatpush1.bf16.msra.mxu0 %v1523_v22  ;;  %1620 = vmatpush3.bf16.msra.mxu1 %v1619_v23  ;;  %v656_v22 = vld [vmem:[#allocation2 + $0x570] sm:$0xff]  ;;  %v659_v23 = vld [vmem:[#allocation2 + $0x588] sm:$0xff] }
 0x128   : > { %1526 = vmatprep.subr.bf16.mxu0 %v1525_v26  ;;  %1622 = vmatprep.subr.bf16.mxu1 %v1621_v27  ;;  %v1555_v26 = vpack.c.bf16 %v659_v23, %v656_v22  ;;  %v1557_v27 = vpack.c.bf16 %v666_v25, %v663_v24  ;;  %v1010_v22 = vld [vmem:[%s2114_s5 + $0xf8] sm:$0xff]  ;;  %v993_v24 = vld [vmem:[%s2114_s5 + $0x70] sm:$0xff] }
 0x129   : > { %v994_v25 = vld [vmem:[%s2114_s5 + $0x78] sm:$0xff] }
 0x12b   : > { %1528 = vmatpush1.bf16.msra.mxu0 %v1527_v53  ;;  %1624 = vmatpush3.bf16.msra.mxu1 %v1623_v35  ;;  %v671_v53 = vld [vmem:[#allocation2 + $0x5e8] sm:$0xff] }
 0x12c   : > { %1530 = vmatprep.subr.bf16.mxu0 %v1529_v37  ;;  %1626 = vmatprep.subr.bf16.mxu1 %v1625_v38  ;;  %v1563_v35 = vpack.c.bf16 %v671_v53, %v668_v34  ;;  %v996_v37 = vld [vmem:[%s2114_s5 + $0x88] sm:$0xff] }
 0x12d   : > { %v1629_v38 = vpack.c.bf16 %v996_v37, %v995_v36  ;;  %v679_v37 = vrot.slane %v674_v31, %v310_v52 }
 0x12f   : > { %1532 = vmatpush1.bf16.msra.mxu0 %v1531_v45  ;;  %1628 = vmatpush3.bf16.msra.mxu1 %v1627_v46  ;;  %v1633_v45 = vpack.c.bf16 %v998_v43, %v997_v42  ;;  %v982_v46 = vld [vmem:[%s2114_s5 + $0x18] sm:$0xff] }
 0x130   : > { %1534 = vmatprep.subr.bf16.mxu0 %v1533_v6  ;;  %1630 = vmatprep.subr.bf16.mxu1 %v1629_v38  ;;  %v999_v6 = vld [vmem:[%s2114_s5 + $0xa0] sm:$0xff]  ;;  %v1635_v48 = vpack.c.bf16 %v982_v46, %v981_v44  ;;  %v683_v38 = vrot.slane %v674_v31, %v314_v54  ;;  %v1012_v44 = vld [vmem:[%s2114_s5 + $0x108] sm:$0xff]  ;;  %v1014_v54 = vld [vmem:[%s2114_s5 + $0x118] sm:$0xff] }
 0x131   : > { %v1637_v49 = vpack.c.bf16 %v1000_v47, %v999_v6  ;;  %v1665_v47 = vpack.c.bf16 %v1014_v54, %v1013_v51 }
 0x132   : > { %968 = vmatmul.mubr.f32.vlgmr.msra.gmra.mrb[4].mxu1 %v480_v56 }
 0x133   : > { %1536 = vmatpush1.bf16.msra.mxu0 %v1535_v57  ;;  %1632 = vmatpush3.bf16.msra.mxu1 %v1631_v41  ;;  %v1001_v57 = vld [vmem:[%s2114_s5 + $0xb0] sm:$0xff] }
 0x134   : > { %1538 = vmatprep.subr.bf16.mxu0 %v1537_v58  ;;  %1634 = vmatprep.subr.bf16.mxu1 %v1633_v45  ;;  %v1002_v58 = vld [vmem:[%s2114_s5 + $0xb8] sm:$0xff] }
 0x135   : > { %v1641_v60 = vpack.c.bf16 %v1002_v58, %v1001_v57  ;;  %v1019_v58 = vld [vmem:[%s2114_s5 + $0x140] sm:$0xff] }
 0x137   : > { %1540 = vmatpush1.bf16.msra.mxu0 %v1539_v63  ;;  %1636 = vmatpush3.bf16.msra.mxu1 %v1635_v48  ;;  %v1003_v63 = vld [vmem:[%s2114_s5 + $0xc0] sm:$0xff] }
 0x138   : > { %1542 = vmatprep.subr.bf16.mxu0 %v1541_v1  ;;  %1638 = vmatprep.subr.bf16.mxu1 %v1637_v49  ;;  %v1004_v1 = vld [vmem:[%s2114_s5 + $0xc8] sm:$0xff]  ;;  %v1015_v48 = vld [vmem:[%s2114_s5 + $0x120] sm:$0xff] }
 0x139   : > { %v1645_v3 = vpack.c.bf16 %v1004_v1, %v1003_v63  ;;  %v1016_v49 = vld [vmem:[%s2114_s5 + $0x128] sm:$0xff]  ;;  %v1677_v63 = vpack.c.bf16 %v1022_v62, %v1021_v61  ;;  %v1023_v1 = vld [vmem:[%s2114_s5 + $0x160] sm:$0xff] }
 0x13b   : > { %1544 = vmatpush1.bf16.msra.mxu0 %v1543_v7  ;;  %v1005_v7 = vld [vmem:[%s2114_s5 + $0xd0] sm:$0xff] }
 0x13c   : > { %1546 = vmatprep.subr.bf16.mxu0 %v1545_v9  ;;  %v1006_v9 = vld [vmem:[%s2114_s5 + $0xd8] sm:$0xff] }
 0x13d   : > { %v1649_v11 = vpack.c.bf16 %v1006_v9, %v1005_v7  ;;  %v1683_v7 = vpack.c.bf16 %v1026_v5, %v1025_v4 }
 0x13f   : > { %1548 = vmatpush1.bf16.msra.mxu0 %v1547_v14  ;;  %v1651_v14 = vpack.c.bf16 %v990_v13, %v989_v12 }
 0x140   : > { %1550 = vmatprep.subr.bf16.mxu0 %v1549_v15  ;;  %v1007_v15 = vld [vmem:[%s2114_s5 + $0xe0] sm:$0xff] }
 0x141   : > { %v1653_v17 = vpack.c.bf16 %v1008_v16, %v1007_v15 }
 0x143   : > { %1552 = vmatpush1.bf16.msra.mxu0 %v1551_v20  ;;  %v1655_v20 = vpack.c.bf16 %v992_v19, %v991_v18 }
 0x144   : > { %1554 = vmatprep.subr.bf16.mxu0 %v1553_v21  ;;  %v1009_v21 = vld [vmem:[%s2114_s5 + $0xf0] sm:$0xff] }
 0x145   : > { %v1657_v23 = vpack.c.bf16 %v1010_v22, %v1009_v21 }
 0x147   : > { %1556 = vmatpush1.bf16.msra.mxu0 %v1555_v26  ;;  %v1659_v26 = vpack.c.bf16 %v994_v25, %v993_v24 }
 0x148   : > { %1558 = vmatprep.subr.bf16.mxu0 %v1557_v27  ;;  %v1761_v27 = vmov 0.0|0.0  }
 0x14b   : > { %1560 = vmatpush1.bf16.msra.mxu0 %v1559_v32  ;;  %v687_v32 = vrot.slane %v674_v31, %v318_v8  ;;  %v1011_v8 = vld [vmem:[%s2114_s5 + $0x100] sm:$0xff] }
 0x14c   : > { %1562 = vmatprep.subr.bf16.mxu0 %v1561_v33  ;;  %v1662_v6 = vpack.c.bf16 %v1012_v44, %v1011_v8 }
 0x14f   : > { %1564 = vmatpush1.bf16.msra.mxu0 %v1563_v35 }
 0x152   : > { %827 = vmatmul.mubr.f32.vlgmr.msra.gmra.mrb[2].mxu0 %v480_v56  ;;  %v984_v56 = vld [vmem:[%s2114_s5 + $0x28] sm:$0xff] }
 0x153   : > { %v1639_v59 = vpack.c.bf16 %v984_v56, %v983_v55  ;;  %v1668_v55 = vpack.c.bf16 %v1016_v49, %v1015_v48  ;;  %v1017_v56 = vld [vmem:[%s2114_s5 + $0x130] sm:$0xff] }
 0x155   : > { %1640 = vmatpush3.bf16.msra.mxu1 %v1639_v59  ;;  %v1020_v59 = vld [vmem:[%s2114_s5 + $0x148] sm:$0xff] }
 0x156   : > { %1642 = vmatprep.subr.bf16.mxu1 %v1641_v60  ;;  %v1674_v60 = vpack.c.bf16 %v1020_v59, %v1019_v58 }
 0x159   : > { %1644 = vmatpush3.bf16.msra.mxu1 %v1643_v2  ;;  %v1024_v2 = vld [vmem:[%s2114_s5 + $0x168] sm:$0xff] }
 0x15a   : > { %1646 = vmatprep.subr.bf16.mxu1 %v1645_v3  ;;  %v1680_v3 = vpack.c.bf16 %v1024_v2, %v1023_v1 }
 0x15d   : > { %1648 = vmatpush3.bf16.msra.mxu1 %v1647_v10 }
 0x15e   : > { %1650 = vmatprep.subr.bf16.mxu1 %v1649_v11 }
 0x161   : > { %1652 = vmatpush3.bf16.msra.mxu1 %v1651_v14  ;;  %v1261_v14 = vld [vmem:[%s2115_s6] ss:$0 sm:$0xff] }
 0x162   : > { %1654 = vmatprep.subr.bf16.mxu1 %v1653_v17 }
 0x165   : > { %1656 = vmatpush3.bf16.msra.mxu1 %v1655_v20 }
 0x166   : > { %1658 = vmatprep.subr.bf16.mxu1 %v1657_v23  ;;  %v1180_v23 = vand.u32 127, %v308_v50 }
 0x168   : > { %vm1181_vm2 = vcmp.lt.s32.totalorder %v1180_v23, 5 }
 0x169   : > { %1660 = vmatpush3.bf16.msra.mxu1 %v1659_v26 }
 0x16a   : > { %1661 = vmatprep.subr.bf16.mxu1 %v1761_v27 }
 0x1e5   : > { %v1296_v28 = vpop.f32.mrb[2].mxu1 }
 0x1e6   : > { %v1297_v29 = vpop.f32.mrb[3].mxu1 }
 0x1e7   : > { %v1298_v30 = vadd.f32 %v1297_v29, %v1296_v28 }
 0x1e9   : > { %v900_v53 = vadd.f32 %v1298_v30, %v687_v32 }
 0x205   : > { %v1331_v33 = vpop.f32.mrb[4].mxu1 }
 0x206   : > { %v1332_v34 = vpop.f32.mrb[5].mxu1 }
 0x207   : > { %v1333_v35 = vadd.f32 %v1332_v34, %v1331_v33 }
 0x209   : > { %v970_v36 = vadd.f32 %v1333_v35, %v900_v53 }
 0x20b   : > { %v975_v9 = vmul.f32 0.01, %v970_v36 }
 0x20d   : > { %v978_v10 = vmax.f32 %v970_v36, %v975_v9 }
 0x225   : > { %v828_v39 = vpop.f32.mrb[2].mxu0 }
 0x226   : > { %v1685_v40 = vadd.f32 %v828_v39, %v679_v37  ;;  %v830_v41 = vpop.f32.mrb[3].mxu0 }
 0x227   : > { %v1686_v42 = vadd.f32 %v830_v41, %v683_v38 }
 0x228   : > { %v973_v43 = vmul.f32 0.01, %v1685_v40 }
 0x229   : > { %v974_v45 = vmul.f32 0.01, %v1686_v42 }
 0x22a   : > { %v976_v52 = vmax.f32 %v1685_v40, %v973_v43 }
 0x22b   : > { %v977_v46 = vmax.f32 %v1686_v42, %v974_v45 }
 0x22d   : > { %1098 = vmatprep.mubr.f32.mxu1 %v977_v46 }
 0x22e   : > { %1099 = vmatmul.mubr.f32.vlgmr.msra.gmra.mrb[6].mxu1 %v976_v52 }
 0x22f   : > { %1663 = vmatpush3.bf16.msra.mxu1 %v1662_v6  ;;  %1418 = vmatprep.mubr.msk.f32.mxu1 %vm1762_vm1, %v1760_v0  ;;  %v1018_v0 = vld [vmem:[%s2114_s5 + $0x138] sm:$0xff] }
 0x230   : > { %1664 = vmatprep.subr.bf16.mxu1 %v1761_v27  ;;  %v1671_v57 = vpack.c.bf16 %v1018_v0, %v1017_v56 }
 0x233   : > { %1666 = vmatpush3.bf16.msra.mxu1 %v1665_v47 }
 0x234   : > { %1667 = vmatprep.subr.bf16.mxu1 %v1761_v27 }
 0x237   : > { %1669 = vmatpush3.bf16.msra.mxu1 %v1668_v55 }
 0x238   : > { %1670 = vmatprep.subr.bf16.mxu1 %v1761_v27 }
 0x23b   : > { %1672 = vmatpush3.bf16.msra.mxu1 %v1671_v57 }
 0x23c   : > { %1673 = vmatprep.subr.bf16.mxu1 %v1761_v27 }
 0x23f   : > { %1675 = vmatpush3.bf16.msra.mxu1 %v1674_v60 }
 0x240   : > { %1676 = vmatprep.subr.bf16.mxu1 %v1761_v27 }
 0x243   : > { %1678 = vmatpush3.bf16.msra.mxu1 %v1677_v63 }
 0x244   : > { %1679 = vmatprep.subr.bf16.mxu1 %v1761_v27 }
 0x247   : > { %1681 = vmatpush3.bf16.msra.mxu1 %v1680_v3 }
 0x248   : > { %1682 = vmatprep.subr.bf16.mxu1 %v1761_v27 }
 0x24b   : > { %1684 = vmatpush3.bf16.msra.mxu1 %v1683_v7 }
 0x24e   : > { %1419 = vmatmul.mubr.f32.vlgmr.msra.gmra.mrb[8].mxu1 %v978_v10 }
 0x301   : > { %v1366_v11 = vpop.f32.mrb[6].mxu1 }
 0x302   : > { %v1367_v12 = vpop.f32.mrb[7].mxu1 }
 0x303   : > { %v1368_v13 = vadd.f32 %v1367_v12, %v1366_v11 }
 0x305   : > { %v1101_v15 = vadd.f32 %v1368_v13, %v1261_v14 }
 0x321   : > { %v1170_v16 = vpop.f32.mrb[8].mxu1 }
 0x322   : > { %v1171_v17 = vadd.f32 %v1170_v16, %v1101_v15  ;;  %v1420_v18 = vpop.f32.mrb[9].mxu1 }
 0x324   : > { %v1174_v19 = vsub.f32 0.0, %v1171_v17 }
 0x326   : > { %v1175_v20 = vmul.f32 1.442695, %v1174_v19 }
 0x328   : > { %1713 = vpow2.f32 %v1175_v20 }
 0x332   : > { %v1714_v21 = vpop.eup %1713 }
 0x333   : > { %v1177_v22 = vadd.f32 1.0, %v1714_v21 }
 0x335   : > { %1715 = vrcp.f32 %v1177_v22 }
 0x33f   : > { %v1716_v24 = vpop.eup %1715 }
 0x340   : > { %v1182_v25 = vsel %vm1181_vm2, %v1716_v24, %v1171_v17 }
 0x341   : > { %1184 = vst.msk [vmem:[%s288_s18] sm:$0xff] %vm1183_vm3, %v1182_v25 }
 0x342 PF: > { %s18_s24 = sadd.s32 1, %s1755_s24  }
 0x343   : > { %p15_p3 = scmp.ge.s32.totalorder %s18_s24, 4  }
 0x345   :  { %17 = sbr.rel (!%p15_p3) target bundleno = 1 (0x1), region = 83 }
 0x34c   :  { %1204 = vsyncpa [#allocation3], 1 }
 0x34d   :  { %1206 = vsyncpa [#allocation3 + $0x1], 1 }

</bundles_post_ra>
